<compile_context>
chip_gen: v7x
topology: tpu7x:2x2x1
jax: 0.10.0
libtpu: 0.0.40
codegen_flags: <defaults>
</compile_context>

<pallas_src>
import math

import jax
import jax.numpy as jnp
from jax import lax
from jax.experimental import pallas as pl
from jax.experimental.pallas import tpu as pltpu


def _lstm_step_and_gate(gates, c0, w_proj_t, b_proj, out_ref, H):
    """Shared tail: gate activations, cell/hidden update, projection, argmax."""
    # Full-vreg activations (gates is one [B, 4H] tile); pick the tanh
    # quarter (g) with a lane mask instead of four sub-vreg EUP pushes.
    sig = jax.nn.sigmoid(gates)
    tnh = jnp.tanh(gates)
    lane = lax.broadcasted_iota(jnp.int32, gates.shape, 1)
    act = jnp.where((lane >= 2 * H) & (lane < 3 * H), tnh, sig)

    i_g = act[:, 0 * H:1 * H]
    f_g = act[:, 1 * H:2 * H]
    g_g = act[:, 2 * H:3 * H]
    o_g = act[:, 3 * H:4 * H]

    if c0 is None:                      # zero initial cell state: f*c0 == 0
        c_new = i_g * g_g
    else:
        c_new = f_g * c0 + i_g * g_g
    h_new = o_g * jnp.tanh(c_new)

    # projection: Linear(hidden_dim, proj_dim)
    logits = (jnp.dot(h_new, w_proj_t, preferred_element_type=jnp.float32)
              + b_proj)

    # softmax is monotonic per row -> hard mask straight from the logits.
    # Forward value of `hard.detach() - prob.detach() + prob` is the hard mask.
    m = jnp.max(logits, axis=1, keepdims=True)
    hard = (logits == m).astype(jnp.float32)

    # single packed output slab [hard | h_new | c_new] -> one output DMA.
    out_ref[...] = jnp.concatenate([hard, h_new, c_new], axis=1)


def rnn_gate_zero_kernel(x_ref, w_ih_t_ref, b_ref, w_proj_t_ref, b_proj_ref,
                         out_ref):
    """First call (hidden is None): h0 = c0 = 0, so only x @ W_ih^T is needed."""
    H = w_proj_t_ref.shape[0]
    gates = (jnp.dot(x_ref[...], w_ih_t_ref[...],
                     preferred_element_type=jnp.float32)
             + b_ref[...])
    _lstm_step_and_gate(gates, None, w_proj_t_ref[...], b_proj_ref[...],
                        out_ref, H)


def rnn_gate_stateful_kernel(xh_ref, c0_ref, w_fused_t_ref, b_ref,
                             w_proj_t_ref, b_proj_ref, out_ref):
    """General call: one fused matmul [x | h0] @ [W_ih^T ; W_hh^T]."""
    H = w_proj_t_ref.shape[0]
    gates = (jnp.dot(xh_ref[...], w_fused_t_ref[...],
                     preferred_element_type=jnp.float32)
             + b_ref[...])
    _lstm_step_and_gate(gates, c0_ref[...], w_proj_t_ref[...], b_proj_ref[...],
                        out_ref, H)


def init_rnn_gate_params(key, input_dim, hidden_dim, proj_dim):
    """PyTorch-style uniform(-1/sqrt(H), 1/sqrt(H)) init, with all kernel-side
    layouts (transposes, fused weight, summed bias) precomputed once."""
    ks = jax.random.split(key, 6)
    k = 1.0 / math.sqrt(hidden_dim)
    w_ih = jax.random.uniform(ks[0], (4 * hidden_dim, input_dim),
                              jnp.float32, -k, k)
    w_hh = jax.random.uniform(ks[1], (4 * hidden_dim, hidden_dim),
                              jnp.float32, -k, k)
    b_ih = jax.random.uniform(ks[2], (4 * hidden_dim,), jnp.float32, -k, k)
    b_hh = jax.random.uniform(ks[3], (4 * hidden_dim,), jnp.float32, -k, k)
    w_proj = jax.random.uniform(ks[4], (proj_dim, hidden_dim),
                                jnp.float32, -k, k)
    b_proj = jax.random.uniform(ks[5], (proj_dim,), jnp.float32, -k, k)
    return dict(
        input_dim=input_dim, hidden_dim=hidden_dim, proj_dim=proj_dim,
        w_ih_t=jnp.asarray(w_ih.T),                               # [D, 4H]
        w_fused_t=jnp.concatenate([w_ih.T, w_hh.T], axis=0),      # [D+H, 4H]
        b_lstm=(b_ih + b_hh).reshape(1, 4 * hidden_dim),          # [1, 4H]
        w_proj_t=jnp.asarray(w_proj.T),                           # [H, P]
        b_proj=b_proj.reshape(1, proj_dim),                       # [1, P]
    )


def rnn_gate_forward(x, params, hidden=None):
    """x: [B, input_dim] float32 (already avg-pooled / embedded).

    Returns (gate, (h, c)); gate has shape (B, proj_dim, 1, 1, 1), matching
    `x_one.view(B, P, 1, 1, 1)` in the PyTorch module.
    """
    B = x.shape[0]
    H = params['hidden_dim']
    P = params['proj_dim']
    x2d = x.reshape(B, -1).astype(jnp.float32)

    vmem = pl.BlockSpec(memory_space=pltpu.MemorySpace.VMEM)
    out_shape = jax.ShapeDtypeStruct((B, P + 2 * H), jnp.float32)

    if hidden is None:
        # zero-initial-state specialization: fewer inputs, one matmul.
        slab = pl.pallas_call(
            rnn_gate_zero_kernel,
            out_shape=out_shape,
            in_specs=[vmem] * 5,
            out_specs=vmem,
        )(x2d, params['w_ih_t'], params['b_lstm'],
          params['w_proj_t'], params['b_proj'])
    else:
        h0 = hidden[0].reshape(B, H).astype(jnp.float32)
        c0 = hidden[1].reshape(B, H).astype(jnp.float32)
        xh = jnp.concatenate([x2d, h0], axis=1)          # [B, D+H]
        slab = pl.pallas_call(
            rnn_gate_stateful_kernel,
            out_shape=out_shape,
            in_specs=[vmem] * 6,
            out_specs=vmem,
        )(xh, c0, params['w_fused_t'], params['b_lstm'],
          params['w_proj_t'], params['b_proj'])

    gate = slab[:, :P]
    h_new = slab[:, P:P + H]
    c_new = slab[:, P + H:]

    # TODO(synk): PyTorch mutates self.hidden_one in place; here the updated
    # (h, c) is returned functionally instead.
    # TODO(synk): straight-through gradient (detach arithmetic) would require
    # a jax.custom_vjp around this forward; only the forward value is kernelized.
    return gate.reshape(B, P, 1, 1, 1), (h_new.reshape(1, B, H),
                                         c_new.reshape(1, B, H))


if __name__ == "__main__":
    B, INPUT_DIM, HIDDEN_DIM, PROJ_DIM = 8, 16, 32, 4

    key = jax.random.PRNGKey(0)
    k_param, k_x1, k_x2 = jax.random.split(key, 3)
    params = init_rnn_gate_params(k_param, INPUT_DIM, HIDDEN_DIM, PROJ_DIM)
    x1 = jax.random.normal(k_x1, (B, INPUT_DIM), jnp.float32)
    x2 = jax.random.normal(k_x2, (B, INPUT_DIM), jnp.float32)

    # first call: zero-initial-state specialized kernel
    gate1, hidden = rnn_gate_forward(x1, params)
    # second call: stateful kernel with a single fused gate matmul
    gate2, hidden2 = rnn_gate_forward(x2, params, hidden)
    jax.block_until_ready((gate1, gate2, hidden2))

    assert gate1.shape == (B, PROJ_DIM, 1, 1, 1)
    assert gate2.shape == (B, PROJ_DIM, 1, 1, 1)
    assert hidden2[0].shape == (1, B, HIDDEN_DIM)
    assert hidden2[1].shape == (1, B, HIDDEN_DIM)
    for g in (gate1, gate2):
        g2d = g.reshape(B, PROJ_DIM)
        # each row is an exact 0/1 argmax mask with at least one winner
        assert bool(jnp.all((g2d == 0.0) | (g2d == 1.0)))
        assert bool(jnp.all(g2d.sum(axis=1) >= 1.0))
    print("KERNEL_OK")
</pallas_src>

<mosaic_0001>
module attributes {stable_mosaic.version = 11 : i64} {
  func.func @rnn_gate_zero_kernel(%arg0: memref<8x16xf32, #tpu.memory_space<vmem>>, %arg1: memref<16x128xf32, #tpu.memory_space<vmem>>, %arg2: memref<1x128xf32, #tpu.memory_space<vmem>>, %arg3: memref<32x4xf32, #tpu.memory_space<vmem>>, %arg4: memref<1x4xf32, #tpu.memory_space<vmem>>, %arg5: memref<8x68xf32, #tpu.memory_space<vmem>>) attributes {dimension_semantics = [], scalar_prefetch = 0 : i64, scratch_operands = 0 : i64, tpu.core_type = #tpu.core_type<tc>} {
    %c0 = arith.constant 0 : index
    %c0_0 = arith.constant 0 : index
    %0 = vector.load %arg0[%c0, %c0_0] : memref<8x16xf32, #tpu.memory_space<vmem>>, vector<8x16xf32>
    %c0_1 = arith.constant 0 : index
    %c0_2 = arith.constant 0 : index
    %1 = vector.load %arg1[%c0_1, %c0_2] : memref<16x128xf32, #tpu.memory_space<vmem>>, vector<16x128xf32>
    %cst = arith.constant dense<0.000000e+00> : vector<8x128xf32>
    %2 = tpu.matmul %0, %1, %cst {dimension_numbers = #tpu.dot_dimension_numbers<[1], [0], [0], [1], [0, 0, 1, 1], [], []>} : vector<8x16xf32>, vector<16x128xf32>, vector<8x128xf32> -> vector<8x128xf32>
    %c0_3 = arith.constant 0 : index
    %c0_4 = arith.constant 0 : index
    %3 = vector.load %arg2[%c0_3, %c0_4] : memref<1x128xf32, #tpu.memory_space<vmem>>, vector<1x128xf32>
    %4 = vector.broadcast %3 : vector<1x128xf32> to vector<8x128xf32>
    %5 = arith.addf %2, %4 : vector<8x128xf32>
    %c0_5 = arith.constant 0 : index
    %c0_6 = arith.constant 0 : index
    %6 = vector.load %arg3[%c0_5, %c0_6] : memref<32x4xf32, #tpu.memory_space<vmem>>, vector<32x4xf32>
    %c0_7 = arith.constant 0 : index
    %c0_8 = arith.constant 0 : index
    %7 = vector.load %arg4[%c0_7, %c0_8] : memref<1x4xf32, #tpu.memory_space<vmem>>, vector<1x4xf32>
    %8 = arith.negf %5 : vector<8x128xf32>
    %9 = math.exp %8 : vector<8x128xf32>
    %cst_9 = arith.constant 1.000000e+00 : f32
    %10 = vector.broadcast %cst_9 : f32 to vector<8x128xf32>
    %11 = arith.addf %10, %9 : vector<8x128xf32>
    %12 = arith.divf %10, %11 : vector<8x128xf32>
    %13 = math.tanh %5 : vector<8x128xf32>
    %14 = tpu.iota {dimensions = array<i32: 1>} : vector<8x128xi32>
    %c64_i32 = arith.constant 64 : i32
    %15 = vector.broadcast %c64_i32 : i32 to vector<8x128xi32>
    %16 = arith.cmpi sge, %14, %15 : vector<8x128xi32>
    %c96_i32 = arith.constant 96 : i32
    %17 = vector.broadcast %c96_i32 : i32 to vector<8x128xi32>
    %18 = arith.cmpi slt, %14, %17 : vector<8x128xi32>
    %19 = arith.andi %16, %18 : vector<8x128xi1>
    %20 = arith.select %19, %13, %12 : vector<8x128xi1>, vector<8x128xf32>
    %21 = vector.extract_strided_slice %20 {offsets = [0, 0], sizes = [8, 32], strides = [1, 1]} : vector<8x128xf32> to vector<8x32xf32>
    %22 = vector.extract_strided_slice %20 {offsets = [0, 64], sizes = [8, 32], strides = [1, 1]} : vector<8x128xf32> to vector<8x32xf32>
    %23 = vector.extract_strided_slice %20 {offsets = [0, 96], sizes = [8, 32], strides = [1, 1]} : vector<8x128xf32> to vector<8x32xf32>
    %24 = arith.mulf %21, %22 : vector<8x32xf32>
    %25 = math.tanh %24 : vector<8x32xf32>
    %26 = arith.mulf %23, %25 : vector<8x32xf32>
    %cst_10 = arith.constant dense<0.000000e+00> : vector<8x4xf32>
    %27 = tpu.matmul %26, %6, %cst_10 {dimension_numbers = #tpu.dot_dimension_numbers<[1], [0], [0], [1], [0, 0, 1, 1], [], []>} : vector<8x32xf32>, vector<32x4xf32>, vector<8x4xf32> -> vector<8x4xf32>
    %28 = vector.broadcast %7 : vector<1x4xf32> to vector<8x4xf32>
    %29 = arith.addf %27, %28 : vector<8x4xf32>
    %cst_11 = arith.constant dense<0xFF800000> : vector<8xf32>
    %30 = vector.multi_reduction <maximumf>, %29, %cst_11 [1] : vector<8x4xf32> to vector<8xf32>
    %31 = vector.shape_cast %30 : vector<8xf32> to vector<8x1xf32>
    %32 = vector.broadcast %31 : vector<8x1xf32> to vector<8x4xf32>
    %33 = arith.cmpf oeq, %29, %32 : vector<8x4xf32>
    %34 = arith.extui %33 : vector<8x4xi1> to vector<8x4xi32>
    %35 = arith.sitofp %34 : vector<8x4xi32> to vector<8x4xf32>
    %36 = tpu.concatenate %35, %26, %24 in 1 : vector<8x4xf32>, vector<8x32xf32>, vector<8x32xf32> -> vector<8x68xf32>
    %c0_12 = arith.constant 0 : index
    %c0_13 = arith.constant 0 : index
    %37 = vector.load %arg5[%c0_12, %c0_13] : memref<8x68xf32, #tpu.memory_space<vmem>>, vector<8x68xf32>
    tpu.vector_store %arg5[%c0_12, %c0_13], %36 {strides = array<i32>} : memref<8x68xf32, #tpu.memory_space<vmem>>, vector<8x68xf32>,
    return
  }
}

</mosaic_0001>

<bundles_post_ra>
// kernel: tpu_custom_call.1
= control target key start
LH: loop header
LB: loop body
LE: loop exit
PB: predicated region body
PF: predicated region fallthrough
CT: control target
= control target key end

     0   :  { %v330_v2 = vmov 0.0|0.0   ;;  %vm331_vm0 = vmmov 0   ;;  %v332_v4 = vmov 0.0   ;;  %s410_s0 = inlined_call_operand.vmem [shape: f32[8,16], index: 0, kind: input, shape index: {}]   ;;  %s411_s1 = inlined_call_operand.vmem [shape: f32[16,128], index: 1, kind: input, shape index: {}]   ;;  %s412_s2 = inlined_call_operand.vmem [shape: f32[1,128], index: 2, kind: input, shape index: {}]   ;;  %s413_s3 = inlined_call_operand.vmem [shape: f32[32,4], index: 3, kind: input, shape index: {}]   ;;  %s414_s4 = inlined_call_operand.vmem [shape: f32[1,4], index: 4, kind: input, shape index: {}]   ;;  %s415_s5 = inlined_call_operand.hbm [shape: f32[8,68], index: 5, kind: output, shape index: {}]  }
   0x1   :  { %v22_v0 = vld [vmem:[%s411_s1] sm:$0xff]  ;;  %v23_v1 = vld [vmem:[%s411_s1 + $0x8] sm:$0xff]  ;;  %281 = vmatprep.subr.bf16.mxu0 %v330_v2  ;;  %267 = vmatprep.mubr.msk.f32.mxu0 %vm331_vm0, %v332_v4 }
   0x2   :  { %v282_v3 = vpack.c.bf16 %v23_v1, %v22_v0 }
   0x3   :  { %10 = vsyncpa [#allocation3], 0  ;;  %284 = vmatprep.subr.bf16.mxu1 %v330_v2  ;;  %278 = vmatprep.mubr.msk.f32.mxu1 %vm331_vm0, %v332_v4  ;;  %v21_v5 = vld [vmem:[%s410_s0] sm:$0xff]  ;;  %vm31_vm1 = vcmask 130048   ;;  %v117_v12 = vlaneseq  ;;  %s333_s0 = smov 64   ;;  %v106_v21 = vld [vmem:[%s413_s3 + $0x8] sm:$0xff] }
   0x4   :  { %283 = vmatpush3.bf16.msra.mxu0 %v282_v3  ;;  %v249_v6 = vld [vmem:[%s412_s2] ss:$0 sm:$0xff]  ;;  %v107_v22 = vld [vmem:[%s413_s3 + $0x10] sm:$0xff]  ;;  %v108_v24 = vld [vmem:[%s413_s3 + $0x18] sm:$0xff]  ;;  %s334_s7 = smov 96   ;;  %s335_s8 = smov 36  }
   0x5   :  { %v118_v14 = vand.u32 127, %v117_v12  ;;  %v105_v20 = vld [vmem:[%s413_s3] sm:$0xff]  ;;  %v288_v25 = vpack.c.bf16 %v108_v24, %v107_v22  ;;  %s336_s9 = smov 32   ;;  %vm143_vm5 = vcmask 261120   ;;  %vm216_vm6 = vcmask 31744   ;;  %s337_s3 = smov [#allocation2]  }
   0x6   :  { %v285_v23 = vpack.c.bf16 %v106_v21, %v105_v20  ;;  %v252_v30 = vld [vmem:[%s414_s4] ss:$0 sm:$0xff]  ;;  %s241_s12 = sshll.u32 %s337_s3, 4  ;;  %vm231_vm8 = vcmask 293888   ;;  %vm233_vm9 = vcmask 556032   ;;  %s242_s12 = int_to_ptr.vmem [resolvable:$true] %s241_s12 }
   0x7   :  { %268 = vmatmul.mubr.msk.f32.vlgmr.msra.gmra.mrb[0].mxu0 %vm31_vm1, %v21_v5  ;;  %vm119_vm2 = vcmp.ge.s32.totalorder %v118_v14, 64  ;;  %vm120_vm3 = vcmp.lt.s32.totalorder %v118_v14, 96  ;;  %s306_s4 = scalar_lea.vmem %s242_s12, 128  ;;  %p311_p1 = scmp.lt.s32.totalorder %s242_s12, %s242_s12 }
   0x8   :  { %vm121_vm4 = vmand %vm119_vm2, %vm120_vm3  ;;  %286 = vmatpush3.bf16.msra.mxu1 %v285_v23  ;;  %p307_p0 = scmp.ne.s32.totalorder %s242_s12, %s306_s4  ;;  %p312_p2 = scmp.lt.s32.totalorder %s306_s4, %s306_s4 }
   0x9   :  { %287 = vmatprep.subr.bf16.mxu1 %v330_v2 }
   0xa   :  { %p313_p3 = por %p312_p2, %p311_p1 }
   0xc   :  { %289 = vmatpush3.bf16.msra.mxu1 %v288_v25  ;;  %p314_p4 = pnand %p313_p3, %p307_p0 }
  0xda   :  { %v101_v7 = vpop.f32.mrb[0].mxu0 }
  0xdb   :  { %v102_v8 = vadd.f32 %v249_v6, %v101_v7  ;;  %v269_v9 = vpop.f32.mrb[1].mxu0 }
  0xdd   :  { %v251_v10 = vmul.f32 -1.442695, %v102_v8 }
  0xdf   :  { %298 = vpow2.f32 %v251_v10 }
  0xe0   :  { %300 = vtanh.f32 %v102_v8 }
  0xe9   :  { %v299_v11 = vpop.eup %298 }
  0xea   :  { %v113_v13 = vadd.f32 1.0, %v299_v11  ;;  %v301_v15 = vpop.eup %300 }
  0xec   :  { %302 = vrcp.f32 %v113_v13 }
  0xf6   :  { %v303_v16 = vpop.eup %302 }
  0xf7   :  { %v122_v17 = vsel %vm121_vm4, %v301_v15, %v303_v16 }
  0xf8   :  { %124 = vrot.lane.b32.xlu0 %v122_v17, %s333_s0 }
 0x16a   :  { %v125_v18 = vpop.permute.xlu0 %124 }
 0x16b   :  { %v127_v19 = vmul.f32 %v125_v18, %v122_v17 }
 0x16d   :  { %304 = vtanh.f32 %v127_v19 }
 0x177   :  { %v305_v26 = vpop.eup %304 }
 0x178   :  { %130 = vrot.lane.b32.xlu0 %v305_v26, %s334_s7 }
 0x1ea   :  { %v131_v27 = vpop.permute.xlu0 %130 }
 0x1eb   :  { %v133_v28 = vmul.f32 %v131_v27, %v122_v17 }
 0x1ed   :  { %223 = vrot.lane.b32.xlu0 %v133_v28, %s335_s8  ;;  %141 = vrot.lane.b32.xlu1 %v133_v28, %s336_s9 }
 0x1f1   :  { %227 = vrot.lane.b32.xlu0 %v127_v19, %s335_s8 }
 0x25f   :  { %v142_v29 = vpop.permute.xlu1 %141  ;;  %v224_v35 = vpop.permute.xlu0 %223 }
 0x260   :  { %279 = vmatmul.mubr.msk.f32.vlgmr.msra.gmra.mrb[0].mxu1 %vm143_vm5, %v142_v29 }
 0x263   :  { %v228_v38 = vpop.permute.xlu0 %227 }
 0x333   :  { %v212_v31 = vpop.f32.mrb[0].mxu1 }
 0x334   :  { %v213_v32 = vadd.f32 %v252_v30, %v212_v31  ;;  %v280_v33 = vpop.f32.mrb[1].mxu1 }
 0x336   :  { %v217_v34 = vsel %vm216_vm6, %v213_v32, -inf }
 0x337   :  { %218 = vmax.xlane.f32.xlu1 %v217_v34 }
 0x3c4   :  { %v219_v36 = vpop.xlane.xlu1 %218 }
 0x3c5   :  { %vm220_vm7 = vcmp.eq.f32.partialorder %v213_v32, %v219_v36 }
 0x3c6   :  { %v254_v37 = vsel %vm220_vm7, 1.0, %v332_v4 }
 0x3c7   :  { %v230_v39 = vsel %vm216_vm6, %v254_v37, %v224_v35 }
 0x3c8   :  { %v232_v40 = vsel %vm231_vm8, %v230_v39, %v228_v38 }
 0x3c9   :  { %234 = vst.msk [vmem:[#allocation2] sm:$0xff] %vm233_vm9, %v232_v40 }
 0x3ca   :  { %317 = shalt.err (!%p314_p4)
}
 0x3cb   :  { %s318_s15 = scalar_lea.hbm %s415_s5, 128 }
 0x3cc   :  { %p319_p5 = scmp.ne.s32.totalorder %s415_s5, %s318_s15  ;;  %p322_p6 = scmp.lt.u32.totalorder %s318_s15, %s415_s5 }
 0x3ce   :  { %p324_p7 = pnand %p322_p6, %p319_p5 }
 0x3d0   :  { %327 = shalt.err (!%p324_p7)
}
 0x3d1   :  { %244 = dma.vmem_to_hbm [thread:$0]  %s242_s12, 128, %s415_s5, [#allocation3]  }
 0x3d2   :  { %328 = dma.done.wait [#allocation3], 128  }
 0x3d3   :  { %329 = vsyncadd [#allocation3], 4294967168 }
 0x3d4   :  { %248 = vsyncpa [#allocation3], 1 }

</bundles_post_ra>
